<compile_context>
chip_gen: v6e
topology: v6e:2x2x1
jax: 0.10.0
libtpu: 0.0.40
codegen_flags: <defaults>
</compile_context>

<pallas_src>
import jax
import jax.numpy as jnp
from jax.experimental import pallas as pl
from jax.experimental.pallas import tpu as pltpu

HIDDEN = 256


def critic_kernel(s_ref, a_ref, w1s_ref, w1a_ref, w2_ref, w3_ref, b_ref, q_ref):
    # Fused layer 1 (both heads): relu(state @ W1_s + action @ W1_a + [b1|b4])
    h = jnp.dot(s_ref[...], w1s_ref[...], preferred_element_type=jnp.float32)
    h = h + jnp.dot(a_ref[...], w1a_ref[...], preferred_element_type=jnp.float32)
    h = jnp.maximum(h + b_ref[0:1, :], 0.0)                      # (tile_b, 512)

    # Fused layer 2 (block-diagonal weights): relu(h @ [[W2,0],[0,W5]] + [b2|b5])
    h = jnp.maximum(
        jnp.dot(h, w2_ref[...], preferred_element_type=jnp.float32)
        + b_ref[1:2, :],
        0.0)                                                     # (tile_b, 512)

    # Fused layer 3 (block-diagonal): [q1 | q2] = h @ [[w3,0],[0,w6]] + [b3|b6]
    q_ref[...] = (jnp.dot(h, w3_ref[...], preferred_element_type=jnp.float32)
                  + b_ref[2:3, 0:2])                             # (tile_b, 2)


def init_linear_params(key, in_dim, out_dim):
    """PyTorch nn.Linear default init: U(-1/sqrt(fan_in), 1/sqrt(fan_in)).
    Weight stored transposed as (in_dim, out_dim)."""
    kw, kb = jax.random.split(key)
    bound = 1.0 / jnp.sqrt(jnp.float32(in_dim))
    w = jax.random.uniform(kw, (in_dim, out_dim), jnp.float32, -bound, bound)
    b = jax.random.uniform(kb, (1, out_dim), jnp.float32, -bound, bound)
    return w, b


def init_critic_params(key, state_dim, action_dim):
    d = state_dim + action_dim
    keys = jax.random.split(key, 6)
    w1, b1 = init_linear_params(keys[0], d, HIDDEN)
    w2, b2 = init_linear_params(keys[1], HIDDEN, HIDDEN)
    w3, b3 = init_linear_params(keys[2], HIDDEN, 1)
    w4, b4 = init_linear_params(keys[3], d, HIDDEN)
    w5, b5 = init_linear_params(keys[4], HIDDEN, HIDDEN)
    w6, b6 = init_linear_params(keys[5], HIDDEN, 1)
    return (w1, b1, w2, b2, w3, b3, w4, b4, w5, b5, w6, b6)


def pack_critic_params(raw_params, state_dim):
    """One-time packing of the 12 per-layer tensors into 5 fused buffers."""
    (w1, b1, w2, b2, w3, b3, w4, b4, w5, b5, w6, b6) = raw_params
    H = HIDDEN

    # Layer 1: lane-concat the two heads, then split by rows (state / action).
    w14 = jnp.concatenate([w1, w4], axis=1)          # (d, 512)
    w1s = w14[:state_dim]                            # (Ds, 512)
    w1a = w14[state_dim:]                            # (Da, 512)

    # Layer 2: block-diagonal (512, 512).
    w25 = jnp.zeros((2 * H, 2 * H), jnp.float32)
    w25 = w25.at[:H, :H].set(w2).at[H:, H:].set(w5)

    # Layer 3: block-diagonal (512, 2).
    w36 = jnp.zeros((2 * H, 2), jnp.float32)
    w36 = w36.at[:H, 0:1].set(w3).at[H:, 1:2].set(w6)

    # All biases packed into one (3, 512) buffer; row 2 lanes [0:2] hold b3|b6.
    b_packed = jnp.zeros((3, 2 * H), jnp.float32)
    b_packed = b_packed.at[0, :].set(jnp.concatenate([b1, b4], axis=1)[0])
    b_packed = b_packed.at[1, :].set(jnp.concatenate([b2, b5], axis=1)[0])
    b_packed = b_packed.at[2, 0].set(b3[0, 0]).at[2, 1].set(b6[0, 0])

    return (w1s, w1a, w25, w36, b_packed)


def critic_forward(state, action, packed_params, tile_b_max=256):
    w1s, w1a, w25, w36, b_packed = packed_params
    B, Ds = state.shape
    Da = action.shape[1]
    H2 = w25.shape[0]  # 2 * HIDDEN

    # Batch tiling: single tile for small batches, 256-row tiles otherwise
    # (256 matches the v6e/v7x MXU height; weights stay resident in VMEM).
    tile_b = B if B <= tile_b_max else tile_b_max
    Bp = ((B + tile_b - 1) // tile_b) * tile_b
    if Bp != B:
        state = jnp.pad(state, ((0, Bp - B), (0, 0)))
        action = jnp.pad(action, ((0, Bp - B), (0, 0)))
    grid = (Bp // tile_b,)

    flops = 2 * Bp * (Ds * H2 + Da * H2 + H2 * H2 + H2 * 2)
    bytes_accessed = 4 * (Bp * (Ds + Da + 2)
                          + w1s.size + w1a.size + w25.size + w36.size
                          + b_packed.size)
    cost = pl.CostEstimate(flops=flops, transcendentals=0,
                           bytes_accessed=bytes_accessed)

    def const_map(i):
        return (0, 0)

    q12 = pl.pallas_call(
        critic_kernel,
        out_shape=jax.ShapeDtypeStruct((Bp, 2), jnp.float32),
        grid=grid,
        in_specs=[
            pl.BlockSpec((tile_b, Ds), lambda i: (i, 0)),   # state tile
            pl.BlockSpec((tile_b, Da), lambda i: (i, 0)),   # action tile
            pl.BlockSpec(w1s.shape, const_map),             # resident weights
            pl.BlockSpec(w1a.shape, const_map),
            pl.BlockSpec(w25.shape, const_map),
            pl.BlockSpec(w36.shape, const_map),
            pl.BlockSpec(b_packed.shape, const_map),
        ],
        out_specs=pl.BlockSpec((tile_b, 2), lambda i: (i, 0)),
        compiler_params=pltpu.CompilerParams(
            dimension_semantics=("parallel",)),
        cost_estimate=cost,
    )(state, action, w1s, w1a, w25, w36, b_packed)

    q1 = q12[:B, 0:1]
    q2 = q12[:B, 1:2]
    return q1, q2


def critic_forward_ref(state, action, raw_params):
    """Pure-JAX reference (mirrors the PyTorch module exactly)."""
    (w1, b1, w2, b2, w3, b3, w4, b4, w5, b5, w6, b6) = raw_params
    sa = jnp.concatenate([state, action], axis=1)
    h = jnp.maximum(sa @ w1 + b1, 0.0)
    h = jnp.maximum(h @ w2 + b2, 0.0)
    q1 = h @ w3 + b3
    g = jnp.maximum(sa @ w4 + b4, 0.0)
    g = jnp.maximum(g @ w5 + b5, 0.0)
    q2 = g @ w6 + b6
    return q1, q2


if __name__ == "__main__":
    key = jax.random.PRNGKey(0)
    k_params, k_state, k_action = jax.random.split(key, 3)

    batch = 8
    state_dim = 17
    action_dim = 6

    raw_params = init_critic_params(k_params, state_dim, action_dim)
    packed_params = pack_critic_params(raw_params, state_dim)

    state = jax.random.normal(k_state, (batch, state_dim), jnp.float32)
    action = jax.random.normal(k_action, (batch, action_dim), jnp.float32)

    q1, q2 = critic_forward(state, action, packed_params)
    jax.block_until_ready((q1, q2))

    q1_ref, q2_ref = critic_forward_ref(state, action, raw_params)
    assert q1.shape == (batch, 1) and q2.shape == (batch, 1)
    assert jnp.allclose(q1, q1_ref, atol=1e-4, rtol=1e-4)
    assert jnp.allclose(q2, q2_ref, atol=1e-4, rtol=1e-4)

    print("KERNEL_OK")
</pallas_src>

<mosaic_0001>
module attributes {stable_mosaic.version = 11 : i64} {
  func.func @critic_kernel(%arg0: i32, %arg1: memref<8x17xf32, #tpu.memory_space<vmem>>, %arg2: memref<8x6xf32, #tpu.memory_space<vmem>>, %arg3: memref<17x512xf32, #tpu.memory_space<vmem>>, %arg4: memref<6x512xf32, #tpu.memory_space<vmem>>, %arg5: memref<512x512xf32, #tpu.memory_space<vmem>>, %arg6: memref<512x2xf32, #tpu.memory_space<vmem>>, %arg7: memref<3x512xf32, #tpu.memory_space<vmem>>, %arg8: memref<8x2xf32, #tpu.memory_space<vmem>>) attributes {dimension_semantics = [#tpu.dimension_semantics<parallel>], iteration_bounds = array<i64: 1>, scalar_prefetch = 0 : i64, scratch_operands = 0 : i64, tpu.core_type = #tpu.core_type<tc>, window_params = [{transform_indices = @transform_0, window_bounds = array<i64: 8, 17>}, {transform_indices = @transform_1, window_bounds = array<i64: 8, 6>}, {pipeline_mode = #tpu.pipeline_mode<synchronous>, transform_indices = @transform_2, window_bounds = array<i64: 17, 512>}, {pipeline_mode = #tpu.pipeline_mode<synchronous>, transform_indices = @transform_3, window_bounds = array<i64: 6, 512>}, {pipeline_mode = #tpu.pipeline_mode<synchronous>, transform_indices = @transform_4, window_bounds = array<i64: 512, 512>}, {pipeline_mode = #tpu.pipeline_mode<synchronous>, transform_indices = @transform_5, window_bounds = array<i64: 512, 2>}, {pipeline_mode = #tpu.pipeline_mode<synchronous>, transform_indices = @transform_6, window_bounds = array<i64: 3, 512>}, {transform_indices = @transform_7, window_bounds = array<i64: 8, 2>}]} {
    %c0 = arith.constant 0 : index
    %c0_0 = arith.constant 0 : index
    %0 = vector.load %arg1[%c0, %c0_0] : memref<8x17xf32, #tpu.memory_space<vmem>>, vector<8x17xf32>
    %c0_1 = arith.constant 0 : index
    %c0_2 = arith.constant 0 : index
    %1 = vector.load %arg3[%c0_1, %c0_2] : memref<17x512xf32, #tpu.memory_space<vmem>>, vector<17x512xf32>
    %cst = arith.constant dense<0.000000e+00> : vector<8x512xf32>
    %2 = tpu.matmul %0, %1, %cst {dimension_numbers = #tpu.dot_dimension_numbers<[1], [0], [0], [1], [0, 0, 1, 1], [], []>} : vector<8x17xf32>, vector<17x512xf32>, vector<8x512xf32> -> vector<8x512xf32>
    %c0_3 = arith.constant 0 : index
    %c0_4 = arith.constant 0 : index
    %3 = vector.load %arg2[%c0_3, %c0_4] : memref<8x6xf32, #tpu.memory_space<vmem>>, vector<8x6xf32>
    %c0_5 = arith.constant 0 : index
    %c0_6 = arith.constant 0 : index
    %4 = vector.load %arg4[%c0_5, %c0_6] : memref<6x512xf32, #tpu.memory_space<vmem>>, vector<6x512xf32>
    %cst_7 = arith.constant dense<0.000000e+00> : vector<8x512xf32>
    %5 = tpu.matmul %3, %4, %cst_7 {dimension_numbers = #tpu.dot_dimension_numbers<[1], [0], [0], [1], [0, 0, 1, 1], [], []>} : vector<8x6xf32>, vector<6x512xf32>, vector<8x512xf32> -> vector<8x512xf32>
    %6 = arith.addf %2, %5 : vector<8x512xf32>
    %c0_8 = arith.constant 0 : index
    %c0_9 = arith.constant 0 : index
    %7 = vector.load %arg7[%c0_8, %c0_9] : memref<3x512xf32, #tpu.memory_space<vmem>>, vector<1x512xf32>
    %8 = vector.broadcast %7 : vector<1x512xf32> to vector<8x512xf32>
    %9 = arith.addf %6, %8 : vector<8x512xf32>
    %cst_10 = arith.constant 0.000000e+00 : f32
    %10 = vector.broadcast %cst_10 : f32 to vector<8x512xf32>
    %11 = arith.maximumf %9, %10 : vector<8x512xf32>
    %c0_11 = arith.constant 0 : index
    %c0_12 = arith.constant 0 : index
    %12 = vector.load %arg5[%c0_11, %c0_12] : memref<512x512xf32, #tpu.memory_space<vmem>>, vector<512x512xf32>
    %cst_13 = arith.constant dense<0.000000e+00> : vector<8x512xf32>
    %13 = tpu.matmul %11, %12, %cst_13 {dimension_numbers = #tpu.dot_dimension_numbers<[1], [0], [0], [1], [0, 0, 1, 1], [], []>} : vector<8x512xf32>, vector<512x512xf32>, vector<8x512xf32> -> vector<8x512xf32>
    %c1 = arith.constant 1 : index
    %c0_14 = arith.constant 0 : index
    %14 = vector.load %arg7[%c1, %c0_14] : memref<3x512xf32, #tpu.memory_space<vmem>>, vector<1x512xf32>
    %15 = vector.broadcast %14 : vector<1x512xf32> to vector<8x512xf32>
    %16 = arith.addf %13, %15 : vector<8x512xf32>
    %cst_15 = arith.constant 0.000000e+00 : f32
    %17 = vector.broadcast %cst_15 : f32 to vector<8x512xf32>
    %18 = arith.maximumf %16, %17 : vector<8x512xf32>
    %c0_16 = arith.constant 0 : index
    %c0_17 = arith.constant 0 : index
    %19 = vector.load %arg6[%c0_16, %c0_17] : memref<512x2xf32, #tpu.memory_space<vmem>>, vector<512x2xf32>
    %cst_18 = arith.constant dense<0.000000e+00> : vector<8x2xf32>
    %20 = tpu.matmul %18, %19, %cst_18 {dimension_numbers = #tpu.dot_dimension_numbers<[1], [0], [0], [1], [0, 0, 1, 1], [], []>} : vector<8x512xf32>, vector<512x2xf32>, vector<8x2xf32> -> vector<8x2xf32>
    %c2 = arith.constant 2 : index
    %c0_19 = arith.constant 0 : index
    %21 = vector.load %arg7[%c2, %c0_19] : memref<3x512xf32, #tpu.memory_space<vmem>>, vector<1x2xf32>
    %22 = vector.broadcast %21 : vector<1x2xf32> to vector<8x2xf32>
    %23 = arith.addf %20, %22 : vector<8x2xf32>
    %c0_20 = arith.constant 0 : index
    %c0_21 = arith.constant 0 : index
    %24 = vector.load %arg8[%c0_20, %c0_21] : memref<8x2xf32, #tpu.memory_space<vmem>>, vector<8x2xf32>
    tpu.vector_store %arg8[%c0_20, %c0_21], %23 {strides = array<i32>} : memref<8x2xf32, #tpu.memory_space<vmem>>, vector<8x2xf32>,
    return
  }
  func.func @transform_0(%arg0: i32) -> (i32, i32) {
    %c0_i32 = arith.constant 0 : i32
    %c0_i32_0 = arith.constant 0 : i32
    return %arg0, %c0_i32 : i32, i32
  }
  func.func @transform_1(%arg0: i32) -> (i32, i32) {
    %c0_i32 = arith.constant 0 : i32
    %c0_i32_0 = arith.constant 0 : i32
    return %arg0, %c0_i32 : i32, i32
  }
  func.func @transform_2(%arg0: i32) -> (i32, i32) {
    %c0_i32 = arith.constant 0 : i32
    %c0_i32_0 = arith.constant 0 : i32
    %c0_i32_1 = arith.constant 0 : i32
    return %c0_i32, %c0_i32_0 : i32, i32
  }
  func.func @transform_3(%arg0: i32) -> (i32, i32) {
    %c0_i32 = arith.constant 0 : i32
    %c0_i32_0 = arith.constant 0 : i32
    %c0_i32_1 = arith.constant 0 : i32
    return %c0_i32, %c0_i32_0 : i32, i32
  }
  func.func @transform_4(%arg0: i32) -> (i32, i32) {
    %c0_i32 = arith.constant 0 : i32
    %c0_i32_0 = arith.constant 0 : i32
    %c0_i32_1 = arith.constant 0 : i32
    return %c0_i32, %c0_i32_0 : i32, i32
  }
  func.func @transform_5(%arg0: i32) -> (i32, i32) {
    %c0_i32 = arith.constant 0 : i32
    %c0_i32_0 = arith.constant 0 : i32
    %c0_i32_1 = arith.constant 0 : i32
    return %c0_i32, %c0_i32_0 : i32, i32
  }
  func.func @transform_6(%arg0: i32) -> (i32, i32) {
    %c0_i32 = arith.constant 0 : i32
    %c0_i32_0 = arith.constant 0 : i32
    %c0_i32_1 = arith.constant 0 : i32
    return %c0_i32, %c0_i32_0 : i32, i32
  }
  func.func @transform_7(%arg0: i32) -> (i32, i32) {
    %c0_i32 = arith.constant 0 : i32
    %c0_i32_0 = arith.constant 0 : i32
    return %arg0, %c0_i32 : i32, i32
  }
}

</mosaic_0001>

<bundles_post_ra>
// kernel: tpu_custom_call.1
= control target key start
LH: loop header
LB: loop body
LE: loop exit
PB: predicated region body
PF: predicated region fallthrough
CT: control target
= control target key end

     0   :  { %12 = vsyncpa [#allocation3], 0  ;;  %s1299_s24 = smov [#allocation2]   ;;  %s1646_s0 = inlined_call_operand.vmem [shape: f32[8,17], index: 0, kind: input, shape index: {}]   ;;  %s1647_s1 = inlined_call_operand.vmem [shape: f32[8,6], index: 1, kind: input, shape index: {}]   ;;  %s1648_s2 = inlined_call_operand.vmem [shape: f32[17,512], index: 2, kind: input, shape index: {}]   ;;  %s1649_s3 = inlined_call_operand.vmem [shape: f32[6,512], index: 3, kind: input, shape index: {}]   ;;  %s1650_s4 = inlined_call_operand.hbm [shape: f32[512,512], index: 4, kind: input, shape index: {}]   ;;  %s1651_s5 = inlined_call_operand.vmem [shape: f32[512,2], index: 5, kind: input, shape index: {}]   ;;  %s1652_s6 = inlined_call_operand.vmem [shape: f32[3,512], index: 6, kind: input, shape index: {}]   ;;  %s1653_s7 = inlined_call_operand.vmem [shape: f32[8,2], index: 7, kind: output, shape index: {}]  }
   0x1   :  { %s26_s25 = sshll.u32 %s1299_s24, 4  ;;  %s27_s25 = int_to_ptr.vmem [resolvable:$true] %s26_s25 }
   0x2   :  { %s1285_s26 = scalar_lea.vmem %s27_s25, 32768  ;;  %p1290_p1 = scmp.lt.s32.totalorder %s27_s25, %s27_s25 }
   0x3   :  { %p1286_p0 = scmp.ne.s32.totalorder %s27_s25, %s1285_s26  ;;  %p1291_p2 = scmp.lt.s32.totalorder %s1285_s26, %s1285_s26 }
   0x5   :  { %p1292_p3 = por %p1291_p2, %p1290_p1 }
   0x7   :  { %p1293_p4 = pnand %p1292_p3, %p1286_p0 }
   0x9   :  { %1296 = shalt.err (!%p1293_p4)
}
   0xa   :  { %s1300_s27 = smov 512   ;;  %s1301_s28 = smov 32  }
   0xb   :  { %32 = dma.hbm_to_vmem [thread:$0]  %s1650_s4, 32768, %s27_s25, [#allocation3], %s1300_s27, %s1300_s27, %s1301_s28  }
   0xc   :  { %1297 = dma.done.wait [#allocation3], 32768  }
   0xd   :  { %1298 = vsyncadd [#allocation3], 4294934528  ;;  %v1302_v0 = vmov 0.0   ;;  %vm62_vm0 = vcmask 1045504   ;;  %vm58_vm1 = vcmask 48128   ;;  %vm221_vm2 = vcmask 1040384  }
   0xe   :  { %139 = vmatprep.mubr.f32.mxu0 %v1302_v0  ;;  %210 = vmatprep.mubr.f32.mxu1 %v1302_v0  ;;  %v55_v1 = vld [vmem:[%s1649_s3 + $0x8] sm:$0x3f]  ;;  %v57_v2 = vld [vmem:[%s1649_s3 + $0x18] sm:$0x3f]  ;;  %v54_v3 = vld [vmem:[%s1649_s3] sm:$0x3f] }
   0xf   :  { %1189 = vmatprep.subr.msk.mxu0 %vm62_vm0, %v55_v1  ;;  %1192 = vmatprep.subr.msk.mxu1 %vm62_vm0, %v57_v2  ;;  %v56_v4 = vld [vmem:[%s1649_s3 + $0x10] sm:$0x3f]  ;;  %v53_v5 = vld [vmem:[%s1647_s1] sm:$0xff]  ;;  %v50_v6 = vld [vmem:[%s1648_s2 + $0x48] sm:$0x1]  ;;  %vm217_vm3 = vcmask 138240  }
  0x10   :  { %1190 = vmatpush1.msk.msra.mxu0 %vm62_vm0, %v54_v3  ;;  %1193 = vmatpush1.msk.msra.mxu1 %vm62_vm0, %v56_v4  ;;  %v52_v7 = vld [vmem:[%s1648_s2 + $0x58] sm:$0x1]  ;;  %v49_v8 = vld [vmem:[%s1648_s2 + $0x40] sm:$0x1]  ;;  %v51_v9 = vld [vmem:[%s1648_s2 + $0x50] sm:$0x1] }
  0x11   :  { %1191 = vmatmul.mubr.msk.f32.vlgmr.msra.gmra.mxu0 %vm58_vm1, %v53_v5  ;;  %1195 = vmatprep.subr.msk.mxu0 %vm221_vm2, %v50_v6  ;;  %v46_v10 = vld [vmem:[%s1648_s2 + $0x28] sm:$0xff]  ;;  %v48_v11 = vld [vmem:[%s1648_s2 + $0x38] sm:$0xff]  ;;  %v45_v12 = vld [vmem:[%s1648_s2 + $0x20] sm:$0xff]  ;;  %vm1182_vm4 = vcmask 15360  }
  0x12   :  { %1198 = vmatprep.subr.msk.mxu1 %vm221_vm2, %v52_v7  ;;  %1194 = vmatmul.mubr.msk.f32.vlgmr.msra.gmra.mxu1 %vm58_vm1, %v53_v5  ;;  %v47_v13 = vld [vmem:[%s1648_s2 + $0x30] sm:$0xff]  ;;  %v42_v14 = vld [vmem:[%s1648_s2 + $0x8] sm:$0xff]  ;;  %v44_v15 = vld [vmem:[%s1648_s2 + $0x18] sm:$0xff] }
  0x13   :  { %1196 = vmatpush1.msk.msra.mxu0 %vm221_vm2, %v49_v8  ;;  %1199 = vmatpush1.msk.msra.mxu1 %vm221_vm2, %v51_v9  ;;  %v41_v16 = vld [vmem:[%s1648_s2] sm:$0xff]  ;;  %v43_v17 = vld [vmem:[%s1648_s2 + $0x10] sm:$0xff]  ;;  %v467_v19 = vld [vmem:[#allocation2 + $0x1e8] sm:$0xff] }
  0x14   :  { %262 = vmatprep.subr.mxu0 %v46_v10  ;;  %333 = vmatprep.subr.mxu1 %v48_v11  ;;  %v40_v18 = vld [vmem:[%s1646_s0] sm:$0xff]  ;;  %v595_v20 = vld [vmem:[#allocation2 + $0x5e8] sm:$0xff] }
  0x15   :  { %263 = vmatpush1.msra.mxu0 %v45_v12  ;;  %334 = vmatpush1.msra.mxu1 %v47_v13  ;;  %v466_v21 = vld [vmem:[#allocation2 + $0x1e0] sm:$0xff]  ;;  %v463_v23 = vld [vmem:[#allocation2 + $0x1c8] sm:$0xff] }
  0x16   :  { %264 = vmatprep.subr.mxu0 %v42_v14  ;;  %335 = vmatprep.subr.mxu1 %v44_v15  ;;  %v594_v22 = vld [vmem:[#allocation2 + $0x5e0] sm:$0xff]  ;;  %v591_v24 = vld [vmem:[#allocation2 + $0x5c8] sm:$0xff] }
  0x17   :  { %265 = vmatpush1.msra.mxu0 %v41_v16  ;;  %298 = vmatprep.mubr.f32.mxu0 %v1302_v0  ;;  %v462_v25 = vld [vmem:[#allocation2 + $0x1c0] sm:$0xff]  ;;  %v459_v27 = vld [vmem:[#allocation2 + $0x1a8] sm:$0xff] }
  0x18   :  { %336 = vmatpush1.msra.mxu1 %v43_v17  ;;  %369 = vmatprep.mubr.f32.mxu1 %v1302_v0  ;;  %v590_v26 = vld [vmem:[#allocation2 + $0x5c0] sm:$0xff]  ;;  %v587_v28 = vld [vmem:[#allocation2 + $0x5a8] sm:$0xff] }
  0x19   :  { %1197 = vmatmul.mubr.msk.f32.vlgmr.msra.gmra.mxu0 %vm217_vm3, %v40_v18  ;;  %1200 = vmatmul.mubr.msk.f32.vlgmr.msra.gmra.mxu1 %vm217_vm3, %v40_v18  ;;  %v458_v29 = vld [vmem:[#allocation2 + $0x1a0] sm:$0xff]  ;;  %v455_v31 = vld [vmem:[#allocation2 + $0x188] sm:$0xff] }
  0x1a   :  { %685 = vmatprep.subr.mxu0 %v467_v19  ;;  %756 = vmatprep.subr.mxu1 %v595_v20  ;;  %v586_v30 = vld [vmem:[#allocation2 + $0x5a0] sm:$0xff]  ;;  %v583_v32 = vld [vmem:[#allocation2 + $0x588] sm:$0xff] }
  0x1b   :  { %686 = vmatpush1.msra.mxu0 %v466_v21  ;;  %757 = vmatpush1.msra.mxu1 %v594_v22  ;;  %v454_v33 = vld [vmem:[#allocation2 + $0x180] sm:$0xff]  ;;  %v451_v35 = vld [vmem:[#allocation2 + $0x168] sm:$0xff] }
  0x1c   :  { %687 = vmatprep.subr.mxu0 %v463_v23  ;;  %758 = vmatprep.subr.mxu1 %v591_v24  ;;  %v582_v34 = vld [vmem:[#allocation2 + $0x580] sm:$0xff]  ;;  %v579_v36 = vld [vmem:[#allocation2 + $0x568] sm:$0xff] }
  0x1d   :  { %688 = vmatpush1.msra.mxu0 %v462_v25  ;;  %759 = vmatpush1.msra.mxu1 %v590_v26  ;;  %v450_v37 = vld [vmem:[#allocation2 + $0x160] sm:$0xff]  ;;  %v447_v39 = vld [vmem:[#allocation2 + $0x148] sm:$0xff] }
  0x1e   :  { %689 = vmatprep.subr.mxu0 %v459_v27  ;;  %760 = vmatprep.subr.mxu1 %v587_v28  ;;  %v578_v38 = vld [vmem:[#allocation2 + $0x560] sm:$0xff]  ;;  %v575_v40 = vld [vmem:[#allocation2 + $0x548] sm:$0xff] }
  0x1f   :  { %690 = vmatpush1.msra.mxu0 %v458_v29  ;;  %761 = vmatpush1.msra.mxu1 %v586_v30  ;;  %v446_v41 = vld [vmem:[#allocation2 + $0x140] sm:$0xff]  ;;  %v443_v43 = vld [vmem:[#allocation2 + $0x128] sm:$0xff] }
  0x20   :  { %691 = vmatprep.subr.mxu0 %v455_v31  ;;  %762 = vmatprep.subr.mxu1 %v583_v32  ;;  %v574_v42 = vld [vmem:[#allocation2 + $0x540] sm:$0xff]  ;;  %v571_v44 = vld [vmem:[#allocation2 + $0x528] sm:$0xff] }
  0x21   :  { %692 = vmatpush1.msra.mxu0 %v454_v33  ;;  %763 = vmatpush1.msra.mxu1 %v582_v34  ;;  %v442_v45 = vld [vmem:[#allocation2 + $0x120] sm:$0xff]  ;;  %v439_v47 = vld [vmem:[#allocation2 + $0x108] sm:$0xff] }
  0x22   :  { %693 = vmatprep.subr.mxu0 %v451_v35  ;;  %764 = vmatprep.subr.mxu1 %v579_v36  ;;  %v570_v46 = vld [vmem:[#allocation2 + $0x520] sm:$0xff]  ;;  %v567_v48 = vld [vmem:[#allocation2 + $0x508] sm:$0xff] }
  0x23   :  { %694 = vmatpush1.msra.mxu0 %v450_v37  ;;  %765 = vmatpush1.msra.mxu1 %v578_v38  ;;  %v438_v49 = vld [vmem:[#allocation2 + $0x100] sm:$0xff]  ;;  %v435_v51 = vld [vmem:[#allocation2 + $0xe8] sm:$0xff] }
  0x24   :  { %695 = vmatprep.subr.mxu0 %v447_v39  ;;  %766 = vmatprep.subr.mxu1 %v575_v40  ;;  %v566_v50 = vld [vmem:[#allocation2 + $0x500] sm:$0xff]  ;;  %v563_v52 = vld [vmem:[#allocation2 + $0x4e8] sm:$0xff] }
  0x25   :  { %696 = vmatpush1.msra.mxu0 %v446_v41  ;;  %767 = vmatpush1.msra.mxu1 %v574_v42  ;;  %v434_v53 = vld [vmem:[#allocation2 + $0xe0] sm:$0xff]  ;;  %v431_v55 = vld [vmem:[#allocation2 + $0xc8] sm:$0xff] }
  0x26   :  { %697 = vmatprep.subr.mxu0 %v443_v43  ;;  %768 = vmatprep.subr.mxu1 %v571_v44  ;;  %v562_v54 = vld [vmem:[#allocation2 + $0x4e0] sm:$0xff]  ;;  %v559_v56 = vld [vmem:[#allocation2 + $0x4c8] sm:$0xff] }
  0x27   :  { %698 = vmatpush1.msra.mxu0 %v442_v45  ;;  %769 = vmatpush1.msra.mxu1 %v570_v46  ;;  %v430_v57 = vld [vmem:[#allocation2 + $0xc0] sm:$0xff]  ;;  %v427_v59 = vld [vmem:[#allocation2 + $0xa8] sm:$0xff] }
  0x28   :  { %699 = vmatprep.subr.mxu0 %v439_v47  ;;  %770 = vmatprep.subr.mxu1 %v567_v48  ;;  %v558_v58 = vld [vmem:[#allocation2 + $0x4c0] sm:$0xff]  ;;  %v555_v60 = vld [vmem:[#allocation2 + $0x4a8] sm:$0xff] }
  0x29   :  { %700 = vmatpush1.msra.mxu0 %v438_v49  ;;  %771 = vmatpush1.msra.mxu1 %v566_v50  ;;  %v426_v61 = vld [vmem:[#allocation2 + $0xa0] sm:$0xff]  ;;  %v423_v63 = vld [vmem:[#allocation2 + $0x88] sm:$0xff] }
  0x2a   :  { %701 = vmatprep.subr.mxu0 %v435_v51  ;;  %772 = vmatprep.subr.mxu1 %v563_v52  ;;  %v554_v62 = vld [vmem:[#allocation2 + $0x4a0] sm:$0xff]  ;;  %v551_v0 = vld [vmem:[#allocation2 + $0x488] sm:$0xff] }
  0x2b   :  { %702 = vmatpush1.msra.mxu0 %v434_v53  ;;  %773 = vmatpush1.msra.mxu1 %v562_v54  ;;  %v422_v1 = vld [vmem:[#allocation2 + $0x80] sm:$0xff]  ;;  %v419_v3 = vld [vmem:[#allocation2 + $0x68] sm:$0xff] }
  0x2c   :  { %703 = vmatprep.subr.mxu0 %v431_v55  ;;  %774 = vmatprep.subr.mxu1 %v559_v56  ;;  %v550_v2 = vld [vmem:[#allocation2 + $0x480] sm:$0xff]  ;;  %v547_v4 = vld [vmem:[#allocation2 + $0x468] sm:$0xff] }
  0x2d   :  { %704 = vmatpush1.msra.mxu0 %v430_v57  ;;  %775 = vmatpush1.msra.mxu1 %v558_v58  ;;  %v418_v5 = vld [vmem:[#allocation2 + $0x60] sm:$0xff]  ;;  %v415_v7 = vld [vmem:[#allocation2 + $0x48] sm:$0xff] }
  0x2e   :  { %705 = vmatprep.subr.mxu0 %v427_v59  ;;  %776 = vmatprep.subr.mxu1 %v555_v60  ;;  %v546_v6 = vld [vmem:[#allocation2 + $0x460] sm:$0xff]  ;;  %v543_v8 = vld [vmem:[#allocation2 + $0x448] sm:$0xff] }
  0x2f   :  { %706 = vmatpush1.msra.mxu0 %v426_v61  ;;  %777 = vmatpush1.msra.mxu1 %v554_v62  ;;  %v414_v9 = vld [vmem:[#allocation2 + $0x40] sm:$0xff]  ;;  %v411_v11 = vld [vmem:[#allocation2 + $0x28] sm:$0xff] }
  0x30   :  { %707 = vmatprep.subr.mxu0 %v423_v63  ;;  %778 = vmatprep.subr.mxu1 %v551_v0  ;;  %v542_v10 = vld [vmem:[#allocation2 + $0x440] sm:$0xff]  ;;  %v539_v12 = vld [vmem:[#allocation2 + $0x428] sm:$0xff] }
  0x31   :  { %708 = vmatpush1.msra.mxu0 %v422_v1  ;;  %779 = vmatpush1.msra.mxu1 %v550_v2  ;;  %v410_v13 = vld [vmem:[#allocation2 + $0x20] sm:$0xff]  ;;  %v407_v15 = vld [vmem:[#allocation2 + $0x8] sm:$0xff] }
  0x32   :  { %709 = vmatprep.subr.mxu0 %v419_v3  ;;  %780 = vmatprep.subr.mxu1 %v547_v4  ;;  %v538_v14 = vld [vmem:[#allocation2 + $0x420] sm:$0xff]  ;;  %v535_v16 = vld [vmem:[#allocation2 + $0x408] sm:$0xff] }
  0x33   :  { %710 = vmatpush1.msra.mxu0 %v418_v5  ;;  %781 = vmatpush1.msra.mxu1 %v546_v6  ;;  %v406_v17 = vld [vmem:[#allocation2] sm:$0xff]  ;;  %v531_v19 = vld [vmem:[#allocation2 + $0x3e8] sm:$0xff] }
  0x34   :  { %711 = vmatprep.subr.mxu0 %v415_v7  ;;  %782 = vmatprep.subr.mxu1 %v543_v8  ;;  %v534_v18 = vld [vmem:[#allocation2 + $0x400] sm:$0xff]  ;;  %v659_v20 = vld [vmem:[#allocation2 + $0x7e8] sm:$0xff] }
  0x35   :  { %712 = vmatpush1.msra.mxu0 %v414_v9  ;;  %783 = vmatpush1.msra.mxu1 %v542_v10  ;;  %v530_v21 = vld [vmem:[#allocation2 + $0x3e0] sm:$0xff]  ;;  %v527_v23 = vld [vmem:[#allocation2 + $0x3c8] sm:$0xff] }
  0x36   :  { %713 = vmatprep.subr.mxu0 %v411_v11  ;;  %784 = vmatprep.subr.mxu1 %v539_v12  ;;  %v658_v22 = vld [vmem:[#allocation2 + $0x7e0] sm:$0xff]  ;;  %v655_v24 = vld [vmem:[#allocation2 + $0x7c8] sm:$0xff] }
  0x37   :  { %714 = vmatpush1.msra.mxu0 %v410_v13  ;;  %785 = vmatpush1.msra.mxu1 %v538_v14  ;;  %v526_v25 = vld [vmem:[#allocation2 + $0x3c0] sm:$0xff]  ;;  %v523_v27 = vld [vmem:[#allocation2 + $0x3a8] sm:$0xff] }
  0x38   :  { %715 = vmatprep.subr.mxu0 %v407_v15  ;;  %786 = vmatprep.subr.mxu1 %v535_v16  ;;  %v654_v26 = vld [vmem:[#allocation2 + $0x7c0] sm:$0xff]  ;;  %v651_v28 = vld [vmem:[#allocation2 + $0x7a8] sm:$0xff] }
  0x39   :  { %716 = vmatpush1.msra.mxu0 %v406_v17  ;;  %787 = vmatpush1.msra.mxu1 %v534_v18  ;;  %v522_v29 = vld [vmem:[#allocation2 + $0x3a0] sm:$0xff]  ;;  %v519_v31 = vld [vmem:[#allocation2 + $0x388] sm:$0xff] }
  0x3a   :  { %717 = vmatprep.subr.mxu0 %v531_v19  ;;  %788 = vmatprep.subr.mxu1 %v659_v20  ;;  %v650_v30 = vld [vmem:[#allocation2 + $0x7a0] sm:$0xff]  ;;  %v647_v32 = vld [vmem:[#allocation2 + $0x788] sm:$0xff]  ;;  %v469_v19 = vld [vmem:[#allocation2 + $0x1f8] sm:$0xff] }
  0x3b   :  { %718 = vmatpush2.msra.mxu0 %v530_v21  ;;  %789 = vmatpush2.msra.mxu1 %v658_v22  ;;  %v518_v33 = vld [vmem:[#allocation2 + $0x380] sm:$0xff]  ;;  %v515_v35 = vld [vmem:[#allocation2 + $0x368] sm:$0xff]  ;;  %v597_v20 = vld [vmem:[#allocation2 + $0x5f8] sm:$0xff]  ;;  %v378_v21 = vlaneseq }
  0x3c   :  { %719 = vmatprep.subr.mxu0 %v527_v23  ;;  %790 = vmatprep.subr.mxu1 %v655_v24  ;;  %v646_v34 = vld [vmem:[#allocation2 + $0x780] sm:$0xff]  ;;  %v643_v36 = vld [vmem:[#allocation2 + $0x768] sm:$0xff] }
  0x3d   :  { %720 = vmatpush2.msra.mxu0 %v526_v25  ;;  %791 = vmatpush2.msra.mxu1 %v654_v26  ;;  %v514_v37 = vld [vmem:[#allocation2 + $0x360] sm:$0xff]  ;;  %v511_v39 = vld [vmem:[#allocation2 + $0x348] sm:$0xff]  ;;  %v1406_v22 = vshrl.u32 %v378_v21, 7  ;;  %v564_v21 = vld [vmem:[#allocation2 + $0x4f0] sm:$0xff] }
  0x3e   :  { %721 = vmatprep.subr.mxu0 %v523_v27  ;;  %792 = vmatprep.subr.mxu1 %v651_v28  ;;  %v642_v38 = vld [vmem:[#allocation2 + $0x760] sm:$0xff]  ;;  %v639_v40 = vld [vmem:[#allocation2 + $0x748] sm:$0xff] }
  0x3f   :  { %722 = vmatpush2.msra.mxu0 %v522_v29  ;;  %793 = vmatpush2.msra.mxu1 %v650_v30  ;;  %v510_v41 = vld [vmem:[#allocation2 + $0x340] sm:$0xff]  ;;  %v507_v43 = vld [vmem:[#allocation2 + $0x328] sm:$0xff]  ;;  %v380_v26 = vsub.s32 0, %v1406_v22  ;;  %v388_v27 = vsub.s32 2, %v1406_v22  ;;  %v384_v29 = vsub.s32 1, %v1406_v22  ;;  %v392_v30 = vsub.s32 3, %v1406_v22 }
  0x40   :  { %723 = vmatprep.subr.mxu0 %v519_v31  ;;  %794 = vmatprep.subr.mxu1 %v647_v32  ;;  %v638_v42 = vld [vmem:[#allocation2 + $0x740] sm:$0xff]  ;;  %v635_v44 = vld [vmem:[#allocation2 + $0x728] sm:$0xff] }
  0x41   :  { %724 = vmatpush2.msra.mxu0 %v518_v33  ;;  %795 = vmatpush2.msra.mxu1 %v646_v34  ;;  %v506_v45 = vld [vmem:[#allocation2 + $0x320] sm:$0xff]  ;;  %v503_v47 = vld [vmem:[#allocation2 + $0x308] sm:$0xff] }
  0x42   :  { %725 = vmatprep.subr.mxu0 %v515_v35  ;;  %796 = vmatprep.subr.mxu1 %v643_v36  ;;  %v634_v46 = vld [vmem:[#allocation2 + $0x720] sm:$0xff]  ;;  %v631_v48 = vld [vmem:[#allocation2 + $0x708] sm:$0xff] }
  0x43   :  { %726 = vmatpush2.msra.mxu0 %v514_v37  ;;  %797 = vmatpush2.msra.mxu1 %v642_v38  ;;  %v502_v49 = vld [vmem:[#allocation2 + $0x300] sm:$0xff]  ;;  %v499_v51 = vld [vmem:[#allocation2 + $0x2e8] sm:$0xff] }
  0x44   :  { %727 = vmatprep.subr.mxu0 %v511_v39  ;;  %798 = vmatprep.subr.mxu1 %v639_v40  ;;  %v630_v50 = vld [vmem:[#allocation2 + $0x700] sm:$0xff]  ;;  %v627_v52 = vld [vmem:[#allocation2 + $0x6e8] sm:$0xff] }
  0x45   :  { %728 = vmatpush2.msra.mxu0 %v510_v41  ;;  %799 = vmatpush2.msra.mxu1 %v638_v42  ;;  %v498_v53 = vld [vmem:[#allocation2 + $0x2e0] sm:$0xff]  ;;  %v495_v55 = vld [vmem:[#allocation2 + $0x2c8] sm:$0xff] }
  0x46   :  { %729 = vmatprep.subr.mxu0 %v507_v43  ;;  %800 = vmatprep.subr.mxu1 %v635_v44  ;;  %v626_v54 = vld [vmem:[#allocation2 + $0x6e0] sm:$0xff]  ;;  %v623_v56 = vld [vmem:[#allocation2 + $0x6c8] sm:$0xff] }
  0x47   :  { %730 = vmatpush2.msra.mxu0 %v506_v45  ;;  %801 = vmatpush2.msra.mxu1 %v634_v46  ;;  %v494_v57 = vld [vmem:[#allocation2 + $0x2c0] sm:$0xff]  ;;  %v491_v59 = vld [vmem:[#allocation2 + $0x2a8] sm:$0xff] }
  0x48   :  { %731 = vmatprep.subr.mxu0 %v503_v47  ;;  %802 = vmatprep.subr.mxu1 %v631_v48  ;;  %v622_v58 = vld [vmem:[#allocation2 + $0x6c0] sm:$0xff]  ;;  %v619_v60 = vld [vmem:[#allocation2 + $0x6a8] sm:$0xff] }
  0x49   :  { %732 = vmatpush2.msra.mxu0 %v502_v49  ;;  %803 = vmatpush2.msra.mxu1 %v630_v50  ;;  %v490_v61 = vld [vmem:[#allocation2 + $0x2a0] sm:$0xff]  ;;  %v487_v63 = vld [vmem:[#allocation2 + $0x288] sm:$0xff] }
  0x4a   :  { %733 = vmatprep.subr.mxu0 %v499_v51  ;;  %804 = vmatprep.subr.mxu1 %v627_v52  ;;  %v618_v62 = vld [vmem:[#allocation2 + $0x6a0] sm:$0xff]  ;;  %v615_v0 = vld [vmem:[#allocation2 + $0x688] sm:$0xff]  ;;  %v468_v52 = vld [vmem:[#allocation2 + $0x1f0] sm:$0xff] }
  0x4b   :  { %734 = vmatpush2.msra.mxu0 %v498_v53  ;;  %805 = vmatpush2.msra.mxu1 %v626_v54  ;;  %v486_v1 = vld [vmem:[#allocation2 + $0x280] sm:$0xff]  ;;  %v483_v3 = vld [vmem:[#allocation2 + $0x268] sm:$0xff]  ;;  %v596_v53 = vld [vmem:[#allocation2 + $0x5f0] sm:$0xff] }
  0x4c   :  { %735 = vmatprep.subr.mxu0 %v495_v55  ;;  %806 = vmatprep.subr.mxu1 %v623_v56  ;;  %v614_v2 = vld [vmem:[#allocation2 + $0x680] sm:$0xff]  ;;  %v611_v4 = vld [vmem:[#allocation2 + $0x668] sm:$0xff]  ;;  %v465_v54 = vld [vmem:[#allocation2 + $0x1d8] sm:$0xff] }
  0x4d   :  { %736 = vmatpush2.msra.mxu0 %v494_v57  ;;  %807 = vmatpush2.msra.mxu1 %v622_v58  ;;  %v482_v5 = vld [vmem:[#allocation2 + $0x260] sm:$0xff]  ;;  %v479_v7 = vld [vmem:[#allocation2 + $0x248] sm:$0xff]  ;;  %v593_v55 = vld [vmem:[#allocation2 + $0x5d8] sm:$0xff] }
  0x4e   :  { %737 = vmatprep.subr.mxu0 %v491_v59  ;;  %808 = vmatprep.subr.mxu1 %v619_v60  ;;  %v610_v6 = vld [vmem:[#allocation2 + $0x660] sm:$0xff]  ;;  %v607_v8 = vld [vmem:[#allocation2 + $0x648] sm:$0xff]  ;;  %v464_v56 = vld [vmem:[#allocation2 + $0x1d0] sm:$0xff] }
  0x4f   :  { %738 = vmatpush2.msra.mxu0 %v490_v61  ;;  %809 = vmatpush2.msra.mxu1 %v618_v62  ;;  %v478_v9 = vld [vmem:[#allocation2 + $0x240] sm:$0xff]  ;;  %v475_v11 = vld [vmem:[#allocation2 + $0x228] sm:$0xff]  ;;  %v592_v57 = vld [vmem:[#allocation2 + $0x5d0] sm:$0xff] }
  0x50   :  { %739 = vmatprep.subr.mxu0 %v487_v63  ;;  %810 = vmatprep.subr.mxu1 %v615_v0  ;;  %v606_v10 = vld [vmem:[#allocation2 + $0x640] sm:$0xff]  ;;  %v603_v12 = vld [vmem:[#allocation2 + $0x628] sm:$0xff]  ;;  %v461_v58 = vld [vmem:[#allocation2 + $0x1b8] sm:$0xff] }
  0x51   :  { %740 = vmatpush2.msra.mxu0 %v486_v1  ;;  %811 = vmatpush2.msra.mxu1 %v614_v2  ;;  %v474_v13 = vld [vmem:[#allocation2 + $0x220] sm:$0xff]  ;;  %v471_v15 = vld [vmem:[#allocation2 + $0x208] sm:$0xff]  ;;  %v589_v59 = vld [vmem:[#allocation2 + $0x5b8] sm:$0xff] }
  0x52   :  { %741 = vmatprep.subr.mxu0 %v483_v3  ;;  %812 = vmatprep.subr.mxu1 %v611_v4  ;;  %v602_v14 = vld [vmem:[#allocation2 + $0x620] sm:$0xff]  ;;  %v599_v16 = vld [vmem:[#allocation2 + $0x608] sm:$0xff]  ;;  %v460_v60 = vld [vmem:[#allocation2 + $0x1b0] sm:$0xff] }
  0x53   :  { %742 = vmatpush2.msra.mxu0 %v482_v5  ;;  %813 = vmatpush2.msra.mxu1 %v610_v6  ;;  %v470_v17 = vld [vmem:[#allocation2 + $0x200] sm:$0xff]  ;;  %v588_v61 = vld [vmem:[#allocation2 + $0x5b0] sm:$0xff]  ;;  %v457_v62 = vld [vmem:[#allocation2 + $0x198] sm:$0xff] }
  0x54   :  { %743 = vmatprep.subr.mxu0 %v479_v7  ;;  %814 = vmatprep.subr.mxu1 %v607_v8  ;;  %v598_v18 = vld [vmem:[#allocation2 + $0x600] sm:$0xff]  ;;  %v585_v63 = vld [vmem:[#allocation2 + $0x598] sm:$0xff]  ;;  %v456_v0 = vld [vmem:[#allocation2 + $0x190] sm:$0xff] }
  0x55   :  { %744 = vmatpush2.msra.mxu0 %v478_v9  ;;  %815 = vmatpush2.msra.mxu1 %v606_v10  ;;  %v376_v28 = vld [vmem:[%s1652_s6] ss:$4 sm:$0xf]  ;;  %v584_v1 = vld [vmem:[#allocation2 + $0x590] sm:$0xff]  ;;  %v453_v2 = vld [vmem:[#allocation2 + $0x178] sm:$0xff] }
  0x56   :  { %745 = vmatprep.subr.mxu0 %v475_v11  ;;  %816 = vmatprep.subr.mxu1 %v603_v12  ;;  %v381_v33 = vrot.slane %v376_v28, %v380_v26  ;;  %v389_v35 = vrot.slane %v376_v28, %v388_v27  ;;  %v385_v38 = vrot.slane %v376_v28, %v384_v29  ;;  %v581_v3 = vld [vmem:[#allocation2 + $0x578] sm:$0xff]  ;;  %v452_v4 = vld [vmem:[#allocation2 + $0x170] sm:$0xff]  ;;  %v1202_v22 = vld [vmem:[%s1652_s6 + $0x2] ss:$0 sm:$0xff] }
  0x57   :  { %746 = vmatpush2.msra.mxu0 %v474_v13  ;;  %817 = vmatpush2.msra.mxu1 %v602_v14  ;;  %v393_v39 = vrot.slane %v376_v28, %v392_v30  ;;  %v580_v5 = vld [vmem:[#allocation2 + $0x570] sm:$0xff]  ;;  %v449_v6 = vld [vmem:[#allocation2 + $0x158] sm:$0xff] }
  0x58   :  { %747 = vmatprep.subr.mxu0 %v471_v15  ;;  %818 = vmatprep.subr.mxu1 %v599_v16  ;;  %v577_v7 = vld [vmem:[#allocation2 + $0x558] sm:$0xff]  ;;  %v448_v8 = vld [vmem:[#allocation2 + $0x150] sm:$0xff] }
  0x59   :  { %748 = vmatpush2.msra.mxu0 %v470_v17  ;;  %819 = vmatpush2.msra.mxu1 %v598_v18  ;;  %v576_v9 = vld [vmem:[#allocation2 + $0x550] sm:$0xff]  ;;  %v445_v10 = vld [vmem:[#allocation2 + $0x138] sm:$0xff] }
  0x5a   :  { %827 = vmatprep.subr.mxu0 %v469_v19  ;;  %898 = vmatprep.subr.mxu1 %v597_v20  ;;  %v573_v11 = vld [vmem:[#allocation2 + $0x538] sm:$0xff]  ;;  %v444_v12 = vld [vmem:[#allocation2 + $0x130] sm:$0xff] }
  0x5b   :  { %v572_v13 = vld [vmem:[#allocation2 + $0x530] sm:$0xff]  ;;  %v441_v14 = vld [vmem:[#allocation2 + $0x118] sm:$0xff] }
  0x5c   :  { %v569_v15 = vld [vmem:[#allocation2 + $0x518] sm:$0xff]  ;;  %v440_v16 = vld [vmem:[#allocation2 + $0x110] sm:$0xff] }
  0x5d   :  { %v568_v17 = vld [vmem:[#allocation2 + $0x510] sm:$0xff]  ;;  %v437_v18 = vld [vmem:[#allocation2 + $0xf8] sm:$0xff] }
  0x5e   :  { %v565_v19 = vld [vmem:[#allocation2 + $0x4f8] sm:$0xff]  ;;  %v436_v20 = vld [vmem:[#allocation2 + $0xf0] sm:$0xff] }
  0x5f   :  { %v560_v28 = vld [vmem:[#allocation2 + $0x4d0] sm:$0xff] }
  0xd1   :  { %v141_v24 = vpop.f32.mrf.mxu0 }
  0xd2   :  { %v212_v23 = vpop.f32.mrf.mxu1 }
  0xd3   :  { %v143_v31 = vpop.f32.mrf.mxu0 }
  0xd4   :  { %v214_v25 = vpop.f32.mrf.mxu1 }
  0xd9   :  { %v300_v32 = vpop.f32.mrf.mxu0  ;;  %v371_v34 = vpop.f32.mrf.mxu1 }
  0xda   :  { %v301_v36 = vadd.f32 %v300_v32, %v141_v24  ;;  %v372_v37 = vadd.f32 %v371_v34, %v212_v23  ;;  %v433_v23 = vld [vmem:[#allocation2 + $0xd8] sm:$0xff]  ;;  %v556_v34 = vld [vmem:[#allocation2 + $0x4b0] sm:$0xff] }
  0xdb   :  { %v302_v40 = vpop.f32.mrf.mxu0  ;;  %v373_v41 = vpop.f32.mrf.mxu1  ;;  %v561_v24 = vld [vmem:[#allocation2 + $0x4d8] sm:$0xff] }
  0xdc   :  { %v303_v42 = vadd.f32 %v302_v40, %v143_v31  ;;  %v374_v43 = vadd.f32 %v373_v41, %v214_v25  ;;  %v1423_v44 = vadd.f32 %v381_v33, %v301_v36  ;;  %v1425_v45 = vadd.f32 %v389_v35, %v372_v37  ;;  %v432_v25 = vld [vmem:[#allocation2 + $0xd0] sm:$0xff]  ;;  %v429_v31 = vld [vmem:[#allocation2 + $0xb8] sm:$0xff] }
  0xdd   :  { %v557_v32 = vld [vmem:[#allocation2 + $0x4b8] sm:$0xff]  ;;  %v428_v33 = vld [vmem:[#allocation2 + $0xb0] sm:$0xff] }
  0xde   :  { %v399_v46 = vadd.f32 %v385_v38, %v303_v42  ;;  %v401_v47 = vadd.f32 %v393_v39, %v374_v43  ;;  %v402_v50 = vmax.f32 %v1423_v44, 0.0  ;;  %v404_v51 = vmax.f32 %v1425_v45, 0.0  ;;  %v425_v35 = vld [vmem:[#allocation2 + $0x98] sm:$0xff]  ;;  %v424_v37 = vld [vmem:[#allocation2 + $0x90] sm:$0xff]  ;;  %v986_v44 = vld [vmem:[%s1651_s5 + $0x68] sm:$0xff] }
  0xdf   :  { %v553_v36 = vld [vmem:[#allocation2 + $0x498] sm:$0xff]  ;;  %v552_v38 = vld [vmem:[#allocation2 + $0x490] sm:$0xff]  ;;  %v1001_v45 = vld [vmem:[%s1651_s5 + $0xe0] sm:$0xff] }
  0xe0   :  { %v403_v48 = vmax.f32 %v399_v46, 0.0  ;;  %v405_v49 = vmax.f32 %v401_v47, 0.0  ;;  %v421_v39 = vld [vmem:[#allocation2 + $0x78] sm:$0xff]  ;;  %v420_v41 = vld [vmem:[#allocation2 + $0x70] sm:$0xff] }
  0xe1   :  { %v549_v40 = vld [vmem:[#allocation2 + $0x478] sm:$0xff]  ;;  %v548_v42 = vld [vmem:[#allocation2 + $0x470] sm:$0xff] }
  0xe2   :  { %749 = vmatprep.mubr.f32.mxu0 %v403_v48  ;;  %820 = vmatprep.mubr.f32.mxu1 %v405_v49  ;;  %v417_v43 = vld [vmem:[#allocation2 + $0x58] sm:$0xff]  ;;  %v416_v47 = vld [vmem:[#allocation2 + $0x50] sm:$0xff] }
  0xe3   :  { %750 = vmatmul.mubr.f32.vlgmr.msra.gmra.mxu0 %v402_v50  ;;  %821 = vmatmul.mubr.f32.vlgmr.msra.gmra.mxu1 %v404_v51  ;;  %v545_v46 = vld [vmem:[#allocation2 + $0x458] sm:$0xff] }
  0xe4   :  { %828 = vmatpush1.msra.mxu0 %v468_v52  ;;  %899 = vmatpush1.msra.mxu1 %v596_v53  ;;  %v541_v52 = vld [vmem:[#allocation2 + $0x438] sm:$0xff]  ;;  %v412_v53 = vld [vmem:[#allocation2 + $0x30] sm:$0xff] }
  0xe5   :  { %829 = vmatprep.subr.mxu0 %v465_v54  ;;  %891 = vmatprep.mubr.f32.mxu0 %v403_v48  ;;  %v544_v48 = vld [vmem:[#allocation2 + $0x450] sm:$0xff] }
  0xe6   :  { %900 = vmatprep.subr.mxu1 %v593_v55  ;;  %962 = vmatprep.mubr.f32.mxu1 %v405_v49  ;;  %v413_v49 = vld [vmem:[#allocation2 + $0x38] sm:$0xff]  ;;  %v540_v54 = vld [vmem:[#allocation2 + $0x430] sm:$0xff] }
  0xe7   :  { %830 = vmatpush1.msra.mxu0 %v464_v56  ;;  %901 = vmatpush1.msra.mxu1 %v592_v57  ;;  %v409_v55 = vld [vmem:[#allocation2 + $0x18] sm:$0xff]  ;;  %v408_v57 = vld [vmem:[#allocation2 + $0x10] sm:$0xff] }
  0xe8   :  { %831 = vmatprep.subr.mxu0 %v461_v58  ;;  %902 = vmatprep.subr.mxu1 %v589_v59  ;;  %v537_v56 = vld [vmem:[#allocation2 + $0x418] sm:$0xff]  ;;  %v536_v58 = vld [vmem:[#allocation2 + $0x410] sm:$0xff] }
  0xe9   :  { %832 = vmatpush1.msra.mxu0 %v460_v60  ;;  %903 = vmatpush1.msra.mxu1 %v588_v61  ;;  %v533_v59 = vld [vmem:[#allocation2 + $0x3f8] sm:$0xff]  ;;  %v532_v61 = vld [vmem:[#allocation2 + $0x3f0] sm:$0xff] }
  0xea   :  { %833 = vmatprep.subr.mxu0 %v457_v62  ;;  %904 = vmatprep.subr.mxu1 %v585_v63  ;;  %v661_v60 = vld [vmem:[#allocation2 + $0x7f8] sm:$0xff]  ;;  %v660_v62 = vld [vmem:[#allocation2 + $0x7f0] sm:$0xff] }
  0xeb   :  { %834 = vmatpush1.msra.mxu0 %v456_v0  ;;  %905 = vmatpush1.msra.mxu1 %v584_v1  ;;  %v529_v63 = vld [vmem:[#allocation2 + $0x3d8] sm:$0xff]  ;;  %v528_v1 = vld [vmem:[#allocation2 + $0x3d0] sm:$0xff] }
  0xec   :  { %835 = vmatprep.subr.mxu0 %v453_v2  ;;  %906 = vmatprep.subr.mxu1 %v581_v3  ;;  %v657_v0 = vld [vmem:[#allocation2 + $0x7d8] sm:$0xff]  ;;  %v656_v2 = vld [vmem:[#allocation2 + $0x7d0] sm:$0xff] }
  0xed   :  { %836 = vmatpush1.msra.mxu0 %v452_v4  ;;  %907 = vmatpush1.msra.mxu1 %v580_v5  ;;  %v525_v3 = vld [vmem:[#allocation2 + $0x3b8] sm:$0xff]  ;;  %v524_v5 = vld [vmem:[#allocation2 + $0x3b0] sm:$0xff] }
  0xee   :  { %837 = vmatprep.subr.mxu0 %v449_v6  ;;  %908 = vmatprep.subr.mxu1 %v577_v7  ;;  %v653_v4 = vld [vmem:[#allocation2 + $0x7b8] sm:$0xff]  ;;  %v652_v6 = vld [vmem:[#allocation2 + $0x7b0] sm:$0xff] }
  0xef   :  { %838 = vmatpush1.msra.mxu0 %v448_v8  ;;  %909 = vmatpush1.msra.mxu1 %v576_v9  ;;  %v521_v7 = vld [vmem:[#allocation2 + $0x398] sm:$0xff]  ;;  %v520_v9 = vld [vmem:[#allocation2 + $0x390] sm:$0xff] }
  0xf0   :  { %839 = vmatprep.subr.mxu0 %v445_v10  ;;  %910 = vmatprep.subr.mxu1 %v573_v11  ;;  %v649_v8 = vld [vmem:[#allocation2 + $0x798] sm:$0xff]  ;;  %v648_v10 = vld [vmem:[#allocation2 + $0x790] sm:$0xff] }
  0xf1   :  { %840 = vmatpush1.msra.mxu0 %v444_v12  ;;  %911 = vmatpush1.msra.mxu1 %v572_v13  ;;  %v517_v11 = vld [vmem:[#allocation2 + $0x378] sm:$0xff]  ;;  %v516_v13 = vld [vmem:[#allocation2 + $0x370] sm:$0xff] }
  0xf2   :  { %841 = vmatprep.subr.mxu0 %v441_v14  ;;  %912 = vmatprep.subr.mxu1 %v569_v15  ;;  %v645_v12 = vld [vmem:[#allocation2 + $0x778] sm:$0xff]  ;;  %v644_v14 = vld [vmem:[#allocation2 + $0x770] sm:$0xff] }
  0xf3   :  { %842 = vmatpush1.msra.mxu0 %v440_v16  ;;  %913 = vmatpush1.msra.mxu1 %v568_v17  ;;  %v513_v15 = vld [vmem:[#allocation2 + $0x358] sm:$0xff]  ;;  %v512_v17 = vld [vmem:[#allocation2 + $0x350] sm:$0xff] }
  0xf4   :  { %843 = vmatprep.subr.mxu0 %v437_v18  ;;  %914 = vmatprep.subr.mxu1 %v565_v19  ;;  %v641_v16 = vld [vmem:[#allocation2 + $0x758] sm:$0xff]  ;;  %v640_v18 = vld [vmem:[#allocation2 + $0x750] sm:$0xff] }
  0xf5   :  { %844 = vmatpush1.msra.mxu0 %v436_v20  ;;  %915 = vmatpush1.msra.mxu1 %v564_v21  ;;  %v509_v19 = vld [vmem:[#allocation2 + $0x338] sm:$0xff]  ;;  %v508_v21 = vld [vmem:[#allocation2 + $0x330] sm:$0xff] }
  0xf6   :  { %845 = vmatprep.subr.mxu0 %v433_v23  ;;  %916 = vmatprep.subr.mxu1 %v561_v24  ;;  %v637_v20 = vld [vmem:[#allocation2 + $0x738] sm:$0xff]  ;;  %v636_v23 = vld [vmem:[#allocation2 + $0x730] sm:$0xff] }
  0xf7   :  { %846 = vmatpush1.msra.mxu0 %v432_v25  ;;  %917 = vmatpush1.msra.mxu1 %v560_v28  ;;  %v505_v24 = vld [vmem:[#allocation2 + $0x318] sm:$0xff]  ;;  %v504_v28 = vld [vmem:[#allocation2 + $0x310] sm:$0xff] }
  0xf8   :  { %847 = vmatprep.subr.mxu0 %v429_v31  ;;  %918 = vmatprep.subr.mxu1 %v557_v32  ;;  %v633_v25 = vld [vmem:[#allocation2 + $0x718] sm:$0xff]  ;;  %v632_v31 = vld [vmem:[#allocation2 + $0x710] sm:$0xff] }
  0xf9   :  { %848 = vmatpush1.msra.mxu0 %v428_v33  ;;  %919 = vmatpush1.msra.mxu1 %v556_v34  ;;  %v501_v32 = vld [vmem:[#allocation2 + $0x2f8] sm:$0xff]  ;;  %v500_v34 = vld [vmem:[#allocation2 + $0x2f0] sm:$0xff] }
  0xfa   :  { %849 = vmatprep.subr.mxu0 %v425_v35  ;;  %920 = vmatprep.subr.mxu1 %v553_v36  ;;  %v629_v33 = vld [vmem:[#allocation2 + $0x6f8] sm:$0xff]  ;;  %v628_v35 = vld [vmem:[#allocation2 + $0x6f0] sm:$0xff] }
  0xfb   :  { %850 = vmatpush1.msra.mxu0 %v424_v37  ;;  %921 = vmatpush1.msra.mxu1 %v552_v38  ;;  %v497_v36 = vld [vmem:[#allocation2 + $0x2d8] sm:$0xff]  ;;  %v496_v38 = vld [vmem:[#allocation2 + $0x2d0] sm:$0xff] }
  0xfc   :  { %851 = vmatprep.subr.mxu0 %v421_v39  ;;  %922 = vmatprep.subr.mxu1 %v549_v40  ;;  %v625_v37 = vld [vmem:[#allocation2 + $0x6d8] sm:$0xff]  ;;  %v624_v39 = vld [vmem:[#allocation2 + $0x6d0] sm:$0xff] }
  0xfd   :  { %852 = vmatpush1.msra.mxu0 %v420_v41  ;;  %923 = vmatpush1.msra.mxu1 %v548_v42  ;;  %v493_v40 = vld [vmem:[#allocation2 + $0x2b8] sm:$0xff]  ;;  %v492_v42 = vld [vmem:[#allocation2 + $0x2b0] sm:$0xff] }
  0xfe   :  { %853 = vmatprep.subr.mxu0 %v417_v43  ;;  %924 = vmatprep.subr.mxu1 %v545_v46  ;;  %v621_v41 = vld [vmem:[#allocation2 + $0x6b8] sm:$0xff]  ;;  %v620_v43 = vld [vmem:[#allocation2 + $0x6b0] sm:$0xff] }
  0xff   :  { %854 = vmatpush1.msra.mxu0 %v416_v47  ;;  %925 = vmatpush1.msra.mxu1 %v544_v48  ;;  %v489_v46 = vld [vmem:[#allocation2 + $0x298] sm:$0xff]  ;;  %v488_v48 = vld [vmem:[#allocation2 + $0x290] sm:$0xff] }
 0x100   :  { %855 = vmatprep.subr.mxu0 %v413_v49  ;;  %926 = vmatprep.subr.mxu1 %v541_v52  ;;  %v617_v47 = vld [vmem:[#allocation2 + $0x698] sm:$0xff]  ;;  %v616_v49 = vld [vmem:[#allocation2 + $0x690] sm:$0xff] }
 0x101   :  { %856 = vmatpush1.msra.mxu0 %v412_v53  ;;  %927 = vmatpush1.msra.mxu1 %v540_v54  ;;  %v485_v52 = vld [vmem:[#allocation2 + $0x278] sm:$0xff]  ;;  %v484_v54 = vld [vmem:[#allocation2 + $0x270] sm:$0xff] }
 0x102   :  { %857 = vmatprep.subr.mxu0 %v409_v55  ;;  %928 = vmatprep.subr.mxu1 %v537_v56  ;;  %v613_v53 = vld [vmem:[#allocation2 + $0x678] sm:$0xff]  ;;  %v612_v55 = vld [vmem:[#allocation2 + $0x670] sm:$0xff] }
 0x103   :  { %858 = vmatpush1.msra.mxu0 %v408_v57  ;;  %929 = vmatpush1.msra.mxu1 %v536_v58  ;;  %v481_v56 = vld [vmem:[#allocation2 + $0x258] sm:$0xff]  ;;  %v480_v58 = vld [vmem:[#allocation2 + $0x250] sm:$0xff] }
 0x104   :  { %859 = vmatprep.subr.mxu0 %v533_v59  ;;  %930 = vmatprep.subr.mxu1 %v661_v60  ;;  %v609_v57 = vld [vmem:[#allocation2 + $0x658] sm:$0xff]  ;;  %v608_v59 = vld [vmem:[#allocation2 + $0x650] sm:$0xff] }
 0x105   :  { %860 = vmatpush2.msra.mxu0 %v532_v61  ;;  %931 = vmatpush2.msra.mxu1 %v660_v62  ;;  %v477_v60 = vld [vmem:[#allocation2 + $0x238] sm:$0xff]  ;;  %v476_v62 = vld [vmem:[#allocation2 + $0x230] sm:$0xff] }
 0x106   :  { %861 = vmatprep.subr.mxu0 %v529_v63  ;;  %932 = vmatprep.subr.mxu1 %v657_v0  ;;  %v605_v61 = vld [vmem:[#allocation2 + $0x638] sm:$0xff]  ;;  %v604_v63 = vld [vmem:[#allocation2 + $0x630] sm:$0xff] }
 0x107   :  { %862 = vmatpush2.msra.mxu0 %v528_v1  ;;  %933 = vmatpush2.msra.mxu1 %v656_v2  ;;  %v473_v0 = vld [vmem:[#allocation2 + $0x218] sm:$0xff]  ;;  %v472_v2 = vld [vmem:[#allocation2 + $0x210] sm:$0xff] }
 0x108   :  { %863 = vmatprep.subr.mxu0 %v525_v3  ;;  %934 = vmatprep.subr.mxu1 %v653_v4  ;;  %v601_v1 = vld [vmem:[#allocation2 + $0x618] sm:$0xff]  ;;  %v600_v3 = vld [vmem:[#allocation2 + $0x610] sm:$0xff] }
 0x109   :  { %864 = vmatpush2.msra.mxu0 %v524_v5  ;;  %935 = vmatpush2.msra.mxu1 %v652_v6  ;;  %v1004_v4 = vld [vmem:[%s1651_s5 + $0xf8] sm:$0xff]  ;;  %v1003_v6 = vld [vmem:[%s1651_s5 + $0xf0] sm:$0xff] }
 0x10a   :  { %865 = vmatprep.subr.mxu0 %v521_v7  ;;  %936 = vmatprep.subr.mxu1 %v649_v8  ;;  %v988_v5 = vld [vmem:[%s1651_s5 + $0x78] sm:$0xff]  ;;  %v987_v7 = vld [vmem:[%s1651_s5 + $0x70] sm:$0xff]  ;;  %v1002_v8 = vld [vmem:[%s1651_s5 + $0xe8] sm:$0xff] }
 0x10b   :  { %866 = vmatpush2.msra.mxu0 %v520_v9  ;;  %937 = vmatpush2.msra.mxu1 %v648_v10  ;;  %v984_v9 = vld [vmem:[%s1651_s5 + $0x58] sm:$0xff]  ;;  %v999_v10 = vld [vmem:[%s1651_s5 + $0xd0] sm:$0xff] }
 0x10c   :  { %867 = vmatprep.subr.mxu0 %v517_v11  ;;  %938 = vmatprep.subr.mxu1 %v645_v12  ;;  %v983_v11 = vld [vmem:[%s1651_s5 + $0x50] sm:$0xff]  ;;  %v1036_v12 = vld [vmem:[%s1651_s5 + $0x1f8] sm:$0xff] }
 0x10d   :  { %868 = vmatpush2.msra.mxu0 %v516_v13  ;;  %939 = vmatpush2.msra.mxu1 %v644_v14  ;;  %v1020_v13 = vld [vmem:[%s1651_s5 + $0x178] sm:$0xff]  ;;  %v1035_v14 = vld [vmem:[%s1651_s5 + $0x1f0] sm:$0xff] }
 0x10e   :  { %869 = vmatprep.subr.mxu0 %v513_v15  ;;  %940 = vmatprep.subr.mxu1 %v641_v16  ;;  %v998_v15 = vld [vmem:[%s1651_s5 + $0xc8] sm:$0xff]  ;;  %v1019_v16 = vld [vmem:[%s1651_s5 + $0x170] sm:$0xff] }
 0x10f   :  { %870 = vmatpush2.msra.mxu0 %v512_v17  ;;  %941 = vmatpush2.msra.mxu1 %v640_v18  ;;  %v982_v17 = vld [vmem:[%s1651_s5 + $0x48] sm:$0xff] }
 0x110   :  { %871 = vmatprep.subr.mxu0 %v509_v19  ;;  %942 = vmatprep.subr.mxu1 %v637_v20  ;;  %v1034_v18 = vld [vmem:[%s1651_s5 + $0x1e8] sm:$0xff]  ;;  %v997_v19 = vld [vmem:[%s1651_s5 + $0xc0] sm:$0xff] }
 0x111   :  { %872 = vmatpush2.msra.mxu0 %v508_v21  ;;  %943 = vmatpush2.msra.mxu1 %v636_v23  ;;  %v1018_v20 = vld [vmem:[%s1651_s5 + $0x168] sm:$0xff]  ;;  %v981_v21 = vld [vmem:[%s1651_s5 + $0x40] sm:$0xff] }
 0x112   :  { %873 = vmatprep.subr.mxu0 %v505_v24  ;;  %944 = vmatprep.subr.mxu1 %v633_v25  ;;  %v1033_v23 = vld [vmem:[%s1651_s5 + $0x1e0] sm:$0xff]  ;;  %v996_v24 = vld [vmem:[%s1651_s5 + $0xb8] sm:$0xff] }
 0x113   :  { %874 = vmatpush2.msra.mxu0 %v504_v28  ;;  %945 = vmatpush2.msra.mxu1 %v632_v31  ;;  %v1017_v25 = vld [vmem:[%s1651_s5 + $0x160] sm:$0xff]  ;;  %v980_v28 = vld [vmem:[%s1651_s5 + $0x38] sm:$0xff] }
 0x114   :  { %875 = vmatprep.subr.mxu0 %v501_v32  ;;  %946 = vmatprep.subr.mxu1 %v629_v33  ;;  %v1032_v31 = vld [vmem:[%s1651_s5 + $0x1d8] sm:$0xff]  ;;  %v995_v32 = vld [vmem:[%s1651_s5 + $0xb0] sm:$0xff] }
 0x115   :  { %876 = vmatpush2.msra.mxu0 %v500_v34  ;;  %947 = vmatpush2.msra.mxu1 %v628_v35  ;;  %v1016_v33 = vld [vmem:[%s1651_s5 + $0x158] sm:$0xff]  ;;  %v979_v34 = vld [vmem:[%s1651_s5 + $0x30] sm:$0xff] }
 0x116   :  { %877 = vmatprep.subr.mxu0 %v497_v36  ;;  %948 = vmatprep.subr.mxu1 %v625_v37  ;;  %v1031_v35 = vld [vmem:[%s1651_s5 + $0x1d0] sm:$0xff]  ;;  %v994_v36 = vld [vmem:[%s1651_s5 + $0xa8] sm:$0xff] }
 0x117   :  { %878 = vmatpush2.msra.mxu0 %v496_v38  ;;  %949 = vmatpush2.msra.mxu1 %v624_v39  ;;  %v1015_v37 = vld [vmem:[%s1651_s5 + $0x150] sm:$0xff]  ;;  %v978_v38 = vld [vmem:[%s1651_s5 + $0x28] sm:$0xff] }
 0x118   :  { %879 = vmatprep.subr.mxu0 %v493_v40  ;;  %950 = vmatprep.subr.mxu1 %v621_v41  ;;  %v1030_v39 = vld [vmem:[%s1651_s5 + $0x1c8] sm:$0xff]  ;;  %v993_v40 = vld [vmem:[%s1651_s5 + $0xa0] sm:$0xff] }
 0x119   :  { %880 = vmatpush2.msra.mxu0 %v492_v42  ;;  %951 = vmatpush2.msra.mxu1 %v620_v43  ;;  %v1014_v41 = vld [vmem:[%s1651_s5 + $0x148] sm:$0xff]  ;;  %v977_v42 = vld [vmem:[%s1651_s5 + $0x20] sm:$0xff] }
 0x11a   :  { %881 = vmatprep.subr.mxu0 %v489_v46  ;;  %952 = vmatprep.subr.mxu1 %v617_v47  ;;  %v1029_v43 = vld [vmem:[%s1651_s5 + $0x1c0] sm:$0xff]  ;;  %v992_v46 = vld [vmem:[%s1651_s5 + $0x98] sm:$0xff] }
 0x11b   :  { %882 = vmatpush2.msra.mxu0 %v488_v48  ;;  %953 = vmatpush2.msra.mxu1 %v616_v49  ;;  %v1013_v47 = vld [vmem:[%s1651_s5 + $0x140] sm:$0xff]  ;;  %v976_v48 = vld [vmem:[%s1651_s5 + $0x18] sm:$0xff] }
 0x11c   :  { %883 = vmatprep.subr.mxu0 %v485_v52  ;;  %954 = vmatprep.subr.mxu1 %v613_v53  ;;  %v1028_v49 = vld [vmem:[%s1651_s5 + $0x1b8] sm:$0xff]  ;;  %v991_v52 = vld [vmem:[%s1651_s5 + $0x90] sm:$0xff] }
 0x11d   :  { %884 = vmatpush2.msra.mxu0 %v484_v54  ;;  %955 = vmatpush2.msra.mxu1 %v612_v55  ;;  %v1012_v53 = vld [vmem:[%s1651_s5 + $0x138] sm:$0xff]  ;;  %v975_v54 = vld [vmem:[%s1651_s5 + $0x10] sm:$0xff] }
 0x11e   :  { %885 = vmatprep.subr.mxu0 %v481_v56  ;;  %956 = vmatprep.subr.mxu1 %v609_v57  ;;  %v1027_v55 = vld [vmem:[%s1651_s5 + $0x1b0] sm:$0xff]  ;;  %v990_v56 = vld [vmem:[%s1651_s5 + $0x88] sm:$0xff] }
 0x11f   :  { %886 = vmatpush2.msra.mxu0 %v480_v58  ;;  %957 = vmatpush2.msra.mxu1 %v608_v59  ;;  %v1011_v57 = vld [vmem:[%s1651_s5 + $0x130] sm:$0xff]  ;;  %v974_v58 = vld [vmem:[%s1651_s5 + $0x8] sm:$0xff] }
 0x120   :  { %887 = vmatprep.subr.mxu0 %v477_v60  ;;  %958 = vmatprep.subr.mxu1 %v605_v61  ;;  %v1026_v59 = vld [vmem:[%s1651_s5 + $0x1a8] sm:$0xff]  ;;  %v989_v60 = vld [vmem:[%s1651_s5 + $0x80] sm:$0xff] }
 0x121   :  { %888 = vmatpush2.msra.mxu0 %v476_v62  ;;  %959 = vmatpush2.msra.mxu1 %v604_v63  ;;  %v1010_v61 = vld [vmem:[%s1651_s5 + $0x128] sm:$0xff]  ;;  %v973_v62 = vld [vmem:[%s1651_s5] sm:$0xff] }
 0x122   :  { %889 = vmatprep.subr.mxu0 %v473_v0  ;;  %960 = vmatprep.subr.mxu1 %v601_v1  ;;  %v1025_v63 = vld [vmem:[%s1651_s5 + $0x1a0] sm:$0xff]  ;;  %v1024_v1 = vld [vmem:[%s1651_s5 + $0x198] sm:$0xff] }
 0x123   :  { %890 = vmatpush2.msra.mxu0 %v472_v2  ;;  %961 = vmatpush2.msra.mxu1 %v600_v3  ;;  %v1009_v0 = vld [vmem:[%s1651_s5 + $0x120] sm:$0xff]  ;;  %v1008_v2 = vld [vmem:[%s1651_s5 + $0x118] sm:$0xff]  ;;  %v1023_v3 = vld [vmem:[%s1651_s5 + $0x190] sm:$0xff] }
 0x124   :  { %892 = vmatmul.mubr.f32.vlgmr.msra.gmra.mxu0 %v402_v50  ;;  %963 = vmatmul.mubr.f32.vlgmr.msra.gmra.mxu1 %v404_v51  ;;  %v985_v50 = vld [vmem:[%s1651_s5 + $0x60] sm:$0xff]  ;;  %v1000_v51 = vld [vmem:[%s1651_s5 + $0xd8] sm:$0xff] }
 0x125   :  { %1203 = vmatprep.subr.mxu0 %v1004_v4  ;;  %1238 = vmatprep.subr.mxu1 %v1036_v12  ;;  %v1007_v4 = vld [vmem:[%s1651_s5 + $0x110] sm:$0xff] }
 0x126   :  { %1204 = vmatpush3.msra.mxu0 %v988_v5  ;;  %1239 = vmatpush3.msra.mxu1 %v1020_v13  ;;  %v1022_v5 = vld [vmem:[%s1651_s5 + $0x188] sm:$0xff] }
 0x127   :  { %1205 = vmatprep.subr.mxu0 %v1003_v6  ;;  %1240 = vmatprep.subr.mxu1 %v1035_v14  ;;  %v1006_v6 = vld [vmem:[%s1651_s5 + $0x108] sm:$0xff] }
 0x128   :  { %1206 = vmatpush3.msra.mxu0 %v987_v7  ;;  %1241 = vmatpush3.msra.mxu1 %v1019_v16  ;;  %v1021_v7 = vld [vmem:[%s1651_s5 + $0x180] sm:$0xff] }
 0x129   :  { %1207 = vmatprep.subr.mxu0 %v1002_v8  ;;  %1242 = vmatprep.subr.mxu1 %v1034_v18  ;;  %v1005_v8 = vld [vmem:[%s1651_s5 + $0x100] sm:$0xff] }
 0x12a   :  { %1208 = vmatpush3.msra.mxu0 %v986_v44  ;;  %1243 = vmatpush3.msra.mxu1 %v1018_v20  ;;  %v1201_v44 = vld [vmem:[%s1652_s6 + $0x1] ss:$4 sm:$0xf] }
 0x12b   :  { %1209 = vmatprep.subr.mxu0 %v1001_v45  ;;  %1244 = vmatprep.subr.mxu1 %v1033_v23  ;;  %v668_v45 = vrot.slane %v1201_v44, %v380_v26  ;;  %v676_v18 = vrot.slane %v1201_v44, %v388_v27  ;;  %v680_v26 = vrot.slane %v1201_v44, %v392_v30 }
 0x12c   :  { %1210 = vmatpush3.msra.mxu0 %v985_v50  ;;  %1245 = vmatpush3.msra.mxu1 %v1017_v25  ;;  %v672_v50 = vrot.slane %v1201_v44, %v384_v29 }
 0x12d   :  { %1211 = vmatprep.subr.mxu0 %v1000_v51  ;;  %1246 = vmatprep.subr.mxu1 %v1032_v31 }
 0x12e   :  { %1212 = vmatpush3.msra.mxu0 %v984_v9  ;;  %1247 = vmatpush3.msra.mxu1 %v1016_v33 }
 0x12f   :  { %1213 = vmatprep.subr.mxu0 %v999_v10  ;;  %1248 = vmatprep.subr.mxu1 %v1031_v35 }
 0x130   :  { %1214 = vmatpush3.msra.mxu0 %v983_v11  ;;  %1249 = vmatpush3.msra.mxu1 %v1015_v37 }
 0x131   :  { %1215 = vmatprep.subr.mxu0 %v998_v15  ;;  %1250 = vmatprep.subr.mxu1 %v1030_v39 }
 0x132   :  { %1216 = vmatpush3.msra.mxu0 %v982_v17  ;;  %1251 = vmatpush3.msra.mxu1 %v1014_v41 }
 0x133   :  { %1217 = vmatprep.subr.mxu0 %v997_v19  ;;  %1252 = vmatprep.subr.mxu1 %v1029_v43 }
 0x134   :  { %1218 = vmatpush3.msra.mxu0 %v981_v21  ;;  %1253 = vmatpush3.msra.mxu1 %v1013_v47 }
 0x135   :  { %1219 = vmatprep.subr.mxu0 %v996_v24  ;;  %1254 = vmatprep.subr.mxu1 %v1028_v49 }
 0x136   :  { %1220 = vmatpush3.msra.mxu0 %v980_v28  ;;  %1255 = vmatpush3.msra.mxu1 %v1012_v53 }
 0x137   :  { %1221 = vmatprep.subr.mxu0 %v995_v32  ;;  %1256 = vmatprep.subr.mxu1 %v1027_v55 }
 0x138   :  { %1222 = vmatpush3.msra.mxu0 %v979_v34  ;;  %1257 = vmatpush3.msra.mxu1 %v1011_v57 }
 0x139   :  { %1223 = vmatprep.subr.mxu0 %v994_v36  ;;  %1258 = vmatprep.subr.mxu1 %v1026_v59 }
 0x13a   :  { %1224 = vmatpush3.msra.mxu0 %v978_v38  ;;  %1259 = vmatpush3.msra.mxu1 %v1010_v61 }
 0x13b   :  { %1225 = vmatprep.subr.mxu0 %v993_v40  ;;  %1260 = vmatprep.subr.mxu1 %v1025_v63 }
 0x13c   :  { %1226 = vmatpush3.msra.mxu0 %v977_v42  ;;  %1261 = vmatpush3.msra.mxu1 %v1009_v0 }
 0x13d   :  { %1227 = vmatprep.subr.mxu0 %v992_v46  ;;  %1262 = vmatprep.subr.mxu1 %v1024_v1 }
 0x13e   :  { %1228 = vmatpush3.msra.mxu0 %v976_v48  ;;  %1263 = vmatpush3.msra.mxu1 %v1008_v2 }
 0x13f   :  { %1229 = vmatprep.subr.mxu0 %v991_v52  ;;  %1264 = vmatprep.subr.mxu1 %v1023_v3 }
 0x140   :  { %1230 = vmatpush3.msra.mxu0 %v975_v54  ;;  %1265 = vmatpush3.msra.mxu1 %v1007_v4 }
 0x141   :  { %1231 = vmatprep.subr.mxu0 %v990_v56  ;;  %1266 = vmatprep.subr.mxu1 %v1022_v5 }
 0x142   :  { %1232 = vmatpush3.msra.mxu0 %v974_v58  ;;  %1267 = vmatpush3.msra.mxu1 %v1006_v6 }
 0x143   :  { %1233 = vmatprep.subr.mxu0 %v989_v60  ;;  %1268 = vmatprep.subr.mxu1 %v1021_v7 }
 0x144   :  { %1234 = vmatpush3.msra.mxu0 %v973_v62  ;;  %1269 = vmatpush3.msra.mxu1 %v1005_v8 }
 0x1a3   :  { %v751_v51 = vpop.f32.mrf.mxu0  ;;  %v822_v9 = vpop.f32.mrf.mxu1 }
 0x1a4   :  { %v752_v10 = vadd.f32 %v751_v51, %v668_v45 }
 0x1a5   :  { %v753_v11 = vpop.f32.mrf.mxu0  ;;  %v824_v14 = vpop.f32.mrf.mxu1 }
 0x1a6   :  { %v754_v12 = vadd.f32 %v753_v11, %v672_v50  ;;  %v823_v13 = vadd.f32 %v822_v9, %v752_v10 }
 0x1a8   :  { %v825_v15 = vadd.f32 %v824_v14, %v754_v12  ;;  %v969_v17 = vmax.f32 %v823_v13, 0.0 }
 0x1aa   :  { %v970_v16 = vmax.f32 %v825_v15, 0.0 }
 0x1ac   :  { %1106 = vmatprep.mubr.f32.mxu0 %v970_v16 }
 0x1ad   :  { %1107 = vmatmul.mubr.f32.vlgmr.msra.gmra.mxu0 %v969_v17 }
 0x1e4   :  { %v893_v19 = vpop.f32.mrf.mxu0  ;;  %v964_v29 = vpop.f32.mrf.mxu1 }
 0x1e5   :  { %v894_v20 = vadd.f32 %v893_v19, %v676_v18 }
 0x1e6   :  { %v895_v21 = vpop.f32.mrf.mxu0  ;;  %v966_v25 = vpop.f32.mrf.mxu1 }
 0x1e7   :  { %v896_v23 = vadd.f32 %v895_v21, %v680_v26  ;;  %v965_v24 = vadd.f32 %v964_v29, %v894_v20 }
 0x1e9   :  { %v967_v28 = vadd.f32 %v966_v25, %v896_v23  ;;  %v971_v32 = vmax.f32 %v965_v24, 0.0 }
 0x1eb   :  { %v972_v31 = vmax.f32 %v967_v28, 0.0 }
 0x1ed   :  { %1176 = vmatprep.mubr.f32.mxu1 %v972_v31 }
 0x1ee   :  { %1177 = vmatmul.mubr.f32.vlgmr.msra.gmra.mxu1 %v971_v32 }
 0x26d   :  { %v1235_v33 = vpop.f32.mrf.mxu0 }
 0x26f   :  { %v1236_v34 = vpop.f32.mrf.mxu0 }
 0x270   :  { %v1237_v35 = vadd.f32 %v1236_v34, %v1235_v33 }
 0x272   :  { %v1109_v36 = vadd.f32 %v1237_v35, %v1202_v22 }
 0x2ae   :  { %v1270_v27 = vpop.f32.mrf.mxu1 }
 0x2b0   :  { %v1271_v30 = vpop.f32.mrf.mxu1 }
 0x2b1   :  { %v1272_v37 = vadd.f32 %v1271_v30, %v1270_v27 }
 0x2b3   :  { %v1179_v38 = vadd.f32 %v1272_v37, %v1109_v36 }
 0x2b5   :  { %1183 = vst.msk [vmem:[%s1653_s7] sm:$0xff] %vm1182_vm4, %v1179_v38 }
 0x2b6   :  { %1188 = vsyncpa [#allocation3], 1 }

</bundles_post_ra>
